<compile_context>
chip_gen: v6e
topology: v6e:2x2x1
jax: 0.10.0
libtpu: 0.0.40
codegen_flags: <defaults>
</compile_context>

<pallas_src>
import jax
import jax.numpy as jnp
from jax import lax
from jax.experimental import pallas as pl
from jax.experimental.pallas import tpu as pltpu


def _stochastic_linear_kernel(x_ref, w_ref, wstd_ref, wn_ref, b_ref,
                              o_ref, acc_ref):
    k = pl.program_id(2)

    @pl.when(k == 0)
    def _():
        acc_ref[...] = jnp.zeros_like(acc_ref)

    # Realise the posterior weight sample in the stream dtype (VPU add/mul;
    # exp was hoisted to the wrapper).
    w_real = w_ref[...] + wn_ref[...] * wstd_ref[...]              # (tn, tk)

    # F.linear contraction without transposing the realised tile:
    # (tm, tk) . (tn, tk) contracted on axis 1 -> (tm, tn), f32 accumulation.
    acc_ref[...] += lax.dot_general(
        x_ref[...], w_real,
        dimension_numbers=(((1,), (1,)), ((), ())),
        preferred_element_type=jnp.float32)

    @pl.when(k == pl.num_programs(2) - 1)
    def _():
        # b_ref is the already-realised bias, (1, tn) f32 -> broadcast add.
        o_ref[...] = (acc_ref[...] + b_ref[...]).astype(o_ref.dtype)


def _round_up(v, m):
    return (v + m - 1) // m * m


def stochastic_linear(x, weight, weight_log_std, weight_noise,
                      bias, bias_log_std, bias_noise,
                      *, tm=1024, tn=256, tk=512,
                      stream_dtype=jnp.bfloat16):
    """Fused stochastic linear forward.

    x:       (B, in_features)
    weight*: (out_features, in_features)
    bias*:   (out_features,)
    returns: (B, out_features), dtype of x

    stream_dtype: dtype of the x / weight / weight_std / weight_noise HBM streams
    (and hence of the MXU operands). bf16 (default) halves HBM bytes and uses the
    full-rate MXU on v6e/v7x; f32 gives the exact path. Accumulation is always f32.
    """
    B, K = x.shape
    N, K2 = weight.shape
    assert K == K2 and bias.shape == (N,)
    out_dtype = x.dtype

    # Clamp tiles to the problem size while keeping TPU alignment:
    # sublane dims multiples of 8, lane dims multiples of 128 (lane-dense output).
    tm = min(tm, _round_up(B, 8))
    tn = min(tn, _round_up(N, 128))
    tk = min(tk, _round_up(K, 128))

    Mp, Np, Kp = _round_up(B, tm), _round_up(N, tn), _round_up(K, tk)

    def pad2(a, rows, cols, dtype):
        return jnp.pad(a, ((0, rows - a.shape[0]),
                           (0, cols - a.shape[1]))).astype(dtype)

    # Zero padding is exact: padded K columns of x are zero, so they contribute
    # nothing to the contraction; padded N rows/cols are sliced off at the end.
    xp    = pad2(x,                        Mp, Kp, stream_dtype)
    wp    = pad2(weight,                   Np, Kp, stream_dtype)
    wstdp = pad2(jnp.exp(weight_log_std),  Np, Kp, stream_dtype)   # hoisted exp
    wnp   = pad2(weight_noise,             Np, Kp, stream_dtype)

    # Realised bias computed once in the wrapper (O(N) work, fused by XLA).
    b_real = (bias + bias_noise * jnp.exp(bias_log_std)).astype(jnp.float32)
    bp = jnp.pad(b_real.reshape(1, N), ((0, 0), (0, Np - N)))

    # N axis first among the parallel axes so v7x megacore sharding gives each
    # TensorCore a disjoint slice of the weight-sized streams. K innermost
    # carries the accumulator.
    grid = (Np // tn, Mp // tm, Kp // tk)

    out = pl.pallas_call(
        _stochastic_linear_kernel,
        out_shape=jax.ShapeDtypeStruct((Mp, Np), out_dtype),
        grid_spec=pltpu.PrefetchScalarGridSpec(
            num_scalar_prefetch=0,
            grid=grid,
            in_specs=[
                pl.BlockSpec((tm, tk), lambda j, i, k: (i, k)),   # x
                pl.BlockSpec((tn, tk), lambda j, i, k: (j, k)),   # weight
                pl.BlockSpec((tn, tk), lambda j, i, k: (j, k)),   # weight_std
                pl.BlockSpec((tn, tk), lambda j, i, k: (j, k)),   # weight_noise
                pl.BlockSpec((1, tn),  lambda j, i, k: (0, j)),   # realised bias
            ],
            out_specs=pl.BlockSpec((tm, tn), lambda j, i, k: (i, j)),
            scratch_shapes=[pltpu.VMEM((tm, tn), jnp.float32)],
        ),
        compiler_params=pltpu.CompilerParams(
            dimension_semantics=("parallel", "parallel", "arbitrary")),
    )(xp, wp, wstdp, wnp, bp)

    return out[:B, :N]


if __name__ == "__main__":
    key = jax.random.PRNGKey(0)

    def make_inputs(key, batch, in_features, out_features):
        k_x, k_w, k_wls, k_wn, k_b, k_bls, k_bn = jax.random.split(key, 7)
        x = jax.random.normal(k_x, (batch, in_features), dtype=jnp.float32)
        weight = jax.random.normal(k_w, (out_features, in_features), jnp.float32) * 0.1
        weight_log_std = jax.random.normal(k_wls, (out_features, in_features), jnp.float32) * 0.1 - 3.0
        bias = jax.random.normal(k_b, (out_features,), jnp.float32) * 0.1
        bias_log_std = jax.random.normal(k_bls, (out_features,), jnp.float32) * 0.1 - 3.0
        # sample_noise(): weight_noise.normal_(), bias_noise.normal_() — drawn here
        # deterministically from the PRNG (synthetic kernel, no checkpoint load).
        weight_noise = jax.random.normal(k_wn, (out_features, in_features), jnp.float32)
        bias_noise = jax.random.normal(k_bn, (out_features,), jnp.float32)
        return x, weight, weight_log_std, weight_noise, bias, bias_log_std, bias_noise

    def reference(x, w, wls, wn, b, bls, bn):
        w_real = w + wn * jnp.exp(wls)
        b_real = b + bn * jnp.exp(bls)
        return x @ w_real.T + b_real

    # --- Small shapes consistent with a Linear layer (single-tile grid) ---
    args = make_inputs(key, batch=8, in_features=32, out_features=16)
    y_ref = reference(*args)

    # bf16-stream / bf16-MXU path (default; v6e/v7x full-rate MXU, f32 accumulation).
    y_bf16 = stochastic_linear(*args)
    jax.block_until_ready(y_bf16)
    assert y_bf16.shape == (8, 16)
    assert jnp.allclose(y_bf16, y_ref, atol=5e-2, rtol=5e-2)

    # f32-stream path (exact-ish).
    y_f32 = stochastic_linear(*args, stream_dtype=jnp.float32)
    jax.block_until_ready(y_f32)
    assert jnp.allclose(y_f32, y_ref, atol=1e-5, rtol=1e-5)

    # --- Multi-tile grid (exercises N-major grid order + K accumulator) ---
    key2 = jax.random.PRNGKey(1)
    args2 = make_inputs(key2, batch=24, in_features=384, out_features=320)
    y2_ref = reference(*args2)

    y2 = stochastic_linear(*args2, tm=8, tn=128, tk=128,
                           stream_dtype=jnp.float32)
    jax.block_until_ready(y2)
    assert y2.shape == (24, 320)
    assert jnp.allclose(y2, y2_ref, atol=1e-4, rtol=1e-4)

    y2_bf16 = stochastic_linear(*args2, tm=8, tn=128, tk=128)
    jax.block_until_ready(y2_bf16)
    assert jnp.allclose(y2_bf16, y2_ref, atol=2e-1, rtol=5e-2)

    print("KERNEL_OK")
</pallas_src>

<mosaic_0001>
module attributes {stable_mosaic.version = 11 : i64} {
  func.func @_stochastic_linear_kernel(%arg0: i32, %arg1: i32, %arg2: i32, %arg3: memref<8x128xbf16, #tpu.memory_space<vmem>>, %arg4: memref<128x128xbf16, #tpu.memory_space<vmem>>, %arg5: memref<128x128xbf16, #tpu.memory_space<vmem>>, %arg6: memref<128x128xbf16, #tpu.memory_space<vmem>>, %arg7: memref<1x128xf32, #tpu.memory_space<vmem>>, %arg8: memref<8x128xf32, #tpu.memory_space<vmem>>, %arg9: memref<8x128xf32, #tpu.memory_space<vmem>>) attributes {dimension_semantics = [#tpu.dimension_semantics<parallel>, #tpu.dimension_semantics<parallel>, #tpu.dimension_semantics<arbitrary>], iteration_bounds = array<i64: 1, 1, 1>, scalar_prefetch = 0 : i64, scratch_operands = 1 : i64, tpu.core_type = #tpu.core_type<tc>, window_params = [{transform_indices = @transform_0, window_bounds = array<i64: 8, 128>}, {transform_indices = @transform_1, window_bounds = array<i64: 128, 128>}, {transform_indices = @transform_2, window_bounds = array<i64: 128, 128>}, {transform_indices = @transform_3, window_bounds = array<i64: 128, 128>}, {transform_indices = @transform_4, window_bounds = array<i64: 1, 128>}, {transform_indices = @transform_5, window_bounds = array<i64: 8, 128>}]} {
    %c0_i32 = arith.constant 0 : i32
    %0 = arith.cmpi eq, %arg2, %c0_i32 : i32
    %1 = arith.extui %0 : i1 to i32
    %c0_i32_0 = arith.constant 0 : i32
    %2 = arith.cmpi ne, %1, %c0_i32_0 : i32
    scf.if %2 {
      %cst_14 = arith.constant 0.000000e+00 : f32
      %16 = vector.broadcast %cst_14 : f32 to vector<8x128xf32>
      %c0_15 = arith.constant 0 : index
      %c0_16 = arith.constant 0 : index
      %17 = vector.load %arg9[%c0_15, %c0_16] : memref<8x128xf32, #tpu.memory_space<vmem>>, vector<8x128xf32>
      tpu.vector_store %arg9[%c0_15, %c0_16], %16 {strides = array<i32>} : memref<8x128xf32, #tpu.memory_space<vmem>>, vector<8x128xf32>,
    } else {
    }
    %c0 = arith.constant 0 : index
    %c0_1 = arith.constant 0 : index
    %3 = vector.load %arg4[%c0, %c0_1] : memref<128x128xbf16, #tpu.memory_space<vmem>>, vector<128x128xbf16>
    %c0_2 = arith.constant 0 : index
    %c0_3 = arith.constant 0 : index
    %4 = vector.load %arg6[%c0_2, %c0_3] : memref<128x128xbf16, #tpu.memory_space<vmem>>, vector<128x128xbf16>
    %c0_4 = arith.constant 0 : index
    %c0_5 = arith.constant 0 : index
    %5 = vector.load %arg5[%c0_4, %c0_5] : memref<128x128xbf16, #tpu.memory_space<vmem>>, vector<128x128xbf16>
    %6 = arith.mulf %4, %5 : vector<128x128xbf16>
    %7 = arith.addf %3, %6 : vector<128x128xbf16>
    %c0_6 = arith.constant 0 : index
    %c0_7 = arith.constant 0 : index
    %8 = vector.load %arg9[%c0_6, %c0_7] : memref<8x128xf32, #tpu.memory_space<vmem>>, vector<8x128xf32>
    %c0_8 = arith.constant 0 : index
    %c0_9 = arith.constant 0 : index
    %9 = vector.load %arg3[%c0_8, %c0_9] : memref<8x128xbf16, #tpu.memory_space<vmem>>, vector<8x128xbf16>
    %cst = arith.constant dense<0.000000e+00> : vector<8x128xf32>
    %10 = tpu.matmul %9, %7, %cst {dimension_numbers = #tpu.dot_dimension_numbers<[1], [1], [0], [0], [0, 0, 1, 0], [], []>} : vector<8x128xbf16>, vector<128x128xbf16>, vector<8x128xf32> -> vector<8x128xf32>
    %11 = arith.addf %8, %10 : vector<8x128xf32>
    %c0_10 = arith.constant 0 : index
    %c0_11 = arith.constant 0 : index
    %12 = vector.load %arg9[%c0_10, %c0_11] : memref<8x128xf32, #tpu.memory_space<vmem>>, vector<8x128xf32>
    tpu.vector_store %arg9[%c0_10, %c0_11], %11 {strides = array<i32>} : memref<8x128xf32, #tpu.memory_space<vmem>>, vector<8x128xf32>,
    %c0_i32_12 = arith.constant 0 : i32
    %13 = arith.cmpi eq, %arg2, %c0_i32_12 : i32
    %14 = arith.extui %13 : i1 to i32
    %c0_i32_13 = arith.constant 0 : i32
    %15 = arith.cmpi ne, %14, %c0_i32_13 : i32
    scf.if %15 {
      %c0_14 = arith.constant 0 : index
      %c0_15 = arith.constant 0 : index
      %16 = vector.load %arg9[%c0_14, %c0_15] : memref<8x128xf32, #tpu.memory_space<vmem>>, vector<8x128xf32>
      %c0_16 = arith.constant 0 : index
      %c0_17 = arith.constant 0 : index
      %17 = vector.load %arg7[%c0_16, %c0_17] : memref<1x128xf32, #tpu.memory_space<vmem>>, vector<1x128xf32>
      %18 = vector.broadcast %17 : vector<1x128xf32> to vector<8x128xf32>
      %19 = arith.addf %16, %18 : vector<8x128xf32>
      %c0_18 = arith.constant 0 : index
      %c0_19 = arith.constant 0 : index
      %20 = vector.load %arg8[%c0_18, %c0_19] : memref<8x128xf32, #tpu.memory_space<vmem>>, vector<8x128xf32>
      tpu.vector_store %arg8[%c0_18, %c0_19], %19 {strides = array<i32>} : memref<8x128xf32, #tpu.memory_space<vmem>>, vector<8x128xf32>,
    } else {
    }
    return
  }
  func.func @transform_0(%arg0: i32, %arg1: i32, %arg2: i32) -> (i32, i32) {
    %c0_i32 = arith.constant 0 : i32
    return %arg1, %arg2 : i32, i32
  }
  func.func @transform_1(%arg0: i32, %arg1: i32, %arg2: i32) -> (i32, i32) {
    %c0_i32 = arith.constant 0 : i32
    return %arg0, %arg2 : i32, i32
  }
  func.func @transform_2(%arg0: i32, %arg1: i32, %arg2: i32) -> (i32, i32) {
    %c0_i32 = arith.constant 0 : i32
    return %arg0, %arg2 : i32, i32
  }
  func.func @transform_3(%arg0: i32, %arg1: i32, %arg2: i32) -> (i32, i32) {
    %c0_i32 = arith.constant 0 : i32
    return %arg0, %arg2 : i32, i32
  }
  func.func @transform_4(%arg0: i32, %arg1: i32, %arg2: i32) -> (i32, i32) {
    %c0_i32 = arith.constant 0 : i32
    %c0_i32_0 = arith.constant 0 : i32
    return %c0_i32, %arg0 : i32, i32
  }
  func.func @transform_5(%arg0: i32, %arg1: i32, %arg2: i32) -> (i32, i32) {
    %c0_i32 = arith.constant 0 : i32
    return %arg1, %arg0 : i32, i32
  }
}

</mosaic_0001>

<bundles_post_ra>
// kernel: tpu_custom_call.1
= control target key start
LH: loop header
LB: loop body
LE: loop exit
PB: predicated region body
PF: predicated region fallthrough
CT: control target
= control target key end

     0   :  { %10 = vsyncpa [#allocation4], 0  ;;  %s512_s0 = inlined_call_operand.hbm [shape: bf16[8,128], index: 0, kind: input, shape index: {}]   ;;  %s513_s1 = inlined_call_operand.hbm [shape: bf16[128,128], index: 1, kind: input, shape index: {}]   ;;  %s514_s2 = inlined_call_operand.hbm [shape: bf16[128,128], index: 2, kind: input, shape index: {}]   ;;  %s515_s3 = inlined_call_operand.hbm [shape: bf16[128,128], index: 3, kind: input, shape index: {}]   ;;  %s516_s4 = inlined_call_operand.vmem [shape: f32[1,128], index: 4, kind: input, shape index: {}]   ;;  %s517_s5 = inlined_call_operand.hbm [shape: f32[8,128], index: 5, kind: output, shape index: {}]  }
   0x1   :  { %11 = vsyncpa [#allocation7], 0 }
   0x2   :  { %12 = vsyncpa [#allocation10], 0 }
   0x3   :  { %13 = vsyncpa [#allocation5], 0  ;;  %s437_s18 = smov [#allocation6]  }
   0x4   :  { %s29_s19 = sshll.u32 %s437_s18, 4  ;;  %s30_s19 = int_to_ptr.vmem [resolvable:$true] %s29_s19 }
   0x5   :  { %s337_s20 = scalar_lea.vmem %s30_s19, 1024  ;;  %p342_p1 = scmp.lt.s32.totalorder %s30_s19, %s30_s19 }
   0x6   :  { %p338_p0 = scmp.ne.s32.totalorder %s30_s19, %s337_s20  ;;  %p343_p2 = scmp.lt.s32.totalorder %s337_s20, %s337_s20 }
   0x8   :  { %p344_p3 = por %p343_p2, %p342_p1 }
   0xa   :  { %p345_p4 = pnand %p344_p3, %p338_p0 }
   0xc   :  { %348 = shalt.err (!%p345_p4)
}
   0xd   :  { %s438_s21 = smov 64   ;;  %s439_s22 = smov 4  }
   0xe   :  { %35 = dma.hbm_to_vmem [thread:$0]  %s513_s1, 1024, %s30_s19, [#allocation7], %s438_s21, %s438_s21, %s439_s22  }
   0xf   :  { %s440_s25 = smov [#allocation3]   ;;  %s441_s27 = smov [#allocation8]  }
  0x10   :  { %s20_s26 = sshll.u32 %s440_s25, 4  ;;  %s41_s28 = sshll.u32 %s441_s27, 4  ;;  %s21_s26 = int_to_ptr.vmem [resolvable:$true] %s20_s26  ;;  %s42_s28 = int_to_ptr.vmem [resolvable:$true] %s41_s28 }
  0x11   :  { %s357_s29 = scalar_lea.vmem %s21_s26, 64  ;;  %p362_p6 = scmp.lt.s32.totalorder %s21_s26, %s21_s26 }
  0x12   :  { %p358_p5 = scmp.ne.s32.totalorder %s21_s26, %s357_s29  ;;  %p363_p7 = scmp.lt.s32.totalorder %s357_s29, %s357_s29 }
  0x14   :  { %p364_p8 = por %p363_p7, %p362_p6 }
  0x16   :  { %p365_p9 = pnand %p364_p8, %p358_p5 }
  0x18   :  { %368 = shalt.err (!%p365_p9)
}
  0x19   :  { %23 = dma.hbm_to_vmem [thread:$0]  %s512_s0, 64, %s21_s26, [#allocation4]  }
  0x1a   :  { %s377_s7 = scalar_lea.vmem %s42_s28, 1024  ;;  %p382_p11 = scmp.lt.s32.totalorder %s42_s28, %s42_s28 }
  0x1b   :  { %p378_p10 = scmp.ne.s32.totalorder %s42_s28, %s377_s7  ;;  %p383_p12 = scmp.lt.s32.totalorder %s377_s7, %s377_s7 }
  0x1d   :  { %p384_p13 = por %p383_p12, %p382_p11 }
  0x1f   :  { %p385_p0 = pnand %p384_p13, %p378_p10 }
  0x21   :  { %388 = shalt.err (!%p385_p0)
}
  0x22   :  { %47 = dma.hbm_to_vmem [thread:$0]  %s514_s2, 1024, %s42_s28, [#allocation7], %s438_s21, %s438_s21, %s439_s22  }
  0x23   :  { %s442_s9 = smov [#allocation9]  }
  0x24   :  { %s53_s10 = sshll.u32 %s442_s9, 4  ;;  %s54_s10 = int_to_ptr.vmem [resolvable:$true] %s53_s10 }
  0x25   :  { %s397_s11 = scalar_lea.vmem %s54_s10, 1024  ;;  %p402_p2 = scmp.lt.s32.totalorder %s54_s10, %s54_s10 }
  0x26   :  { %p398_p1 = scmp.ne.s32.totalorder %s54_s10, %s397_s11  ;;  %p403_p3 = scmp.lt.s32.totalorder %s397_s11, %s397_s11 }
  0x28   :  { %p404_p4 = por %p403_p3, %p402_p2 }
  0x2a   :  { %p405_p5 = pnand %p404_p4, %p398_p1 }
  0x2c   :  { %408 = shalt.err (!%p405_p5)
}
  0x2d   :  { %59 = dma.hbm_to_vmem [thread:$0]  %s515_s3, 1024, %s54_s10, [#allocation10], %s438_s21, %s438_s21, %s439_s22  }
  0x2e   :  { %429 = dma.done.wait [#allocation4], 64  }
  0x2f   :  { %430 = vsyncadd [#allocation4], 4294967232 }
  0x30   :  { %431 = dma.done.wait [#allocation7], 2048  }
  0x31   :  { %432 = vsyncadd [#allocation7], 4294965248 }
  0x32   :  { %433 = dma.done.wait [#allocation10], 1024  }
  0x33   :  { %434 = vsyncadd [#allocation10], 4294966272  ;;  %v443_v0 = vmov 0.0   ;;  %vm444_vm0 = vmmov 0   ;;  %v94_v1 = vld [vmem:[#allocation6 + $0x38] sm:$0xf] }
  0x34   :  { %300 = vmatprep.subr.bf16.mxu0 %v443_v0  ;;  %316 = vmatprep.mubr.msk.bf16.mxu0 %vm444_vm0, %v443_v0  ;;  %v95_v2 = vld [vmem:[#allocation6 + $0x3c] sm:$0xf]  ;;  %v110_v3 = vld [vmem:[#allocation9 + $0x38] sm:$0xf]  ;;  %v108_v9 = vld [vmem:[#allocation9 + $0x30] sm:$0xf] }
  0x35   :  { %v111_v4 = vld [vmem:[#allocation9 + $0x3c] sm:$0xf]  ;;  %v126_v5 = vld [vmem:[#allocation8 + $0x38] sm:$0xf]  ;;  %v109_v10 = vld [vmem:[#allocation9 + $0x34] sm:$0xf] }
  0x36   :  { %v127_v6 = vld [vmem:[#allocation8 + $0x3c] sm:$0xf]  ;;  %v142_v7 = vmul.bf16 %v126_v5, %v110_v3  ;;  %v124_v11 = vld [vmem:[#allocation8 + $0x30] sm:$0xf]  ;;  %v125_v12 = vld [vmem:[#allocation8 + $0x34] sm:$0xf] }
  0x37   :  { %v143_v8 = vmul.bf16 %v127_v6, %v111_v4  ;;  %v140_v15 = vmul.bf16 %v124_v11, %v108_v9  ;;  %v141_v16 = vmul.bf16 %v125_v12, %v109_v10  ;;  %v92_v17 = vld [vmem:[#allocation6 + $0x30] sm:$0xf]  ;;  %v93_v18 = vld [vmem:[#allocation6 + $0x34] sm:$0xf]  ;;  %v106_v22 = vld [vmem:[#allocation9 + $0x28] sm:$0xf] }
  0x38   :  { %v158_v13 = vadd.bf16 %v142_v7, %v94_v1  ;;  %v107_v23 = vld [vmem:[#allocation9 + $0x2c] sm:$0xf]  ;;  %v122_v24 = vld [vmem:[#allocation8 + $0x28] sm:$0xf]  ;;  %v104_v33 = vld [vmem:[#allocation9 + $0x20] sm:$0xf] }
  0x39   :  { %v159_v14 = vadd.bf16 %v143_v8, %v95_v2  ;;  %v156_v20 = vadd.bf16 %v140_v15, %v92_v17  ;;  %v157_v21 = vadd.bf16 %v141_v16, %v93_v18  ;;  %v123_v25 = vld [vmem:[#allocation8 + $0x2c] sm:$0xf]  ;;  %v138_v27 = vmul.bf16 %v122_v24, %v106_v22  ;;  %v90_v29 = vld [vmem:[#allocation6 + $0x28] sm:$0xf]  ;;  %v105_v34 = vld [vmem:[#allocation9 + $0x24] sm:$0xf] }
  0x3a   :  { %v139_v28 = vmul.bf16 %v123_v25, %v107_v23  ;;  %v91_v30 = vld [vmem:[#allocation6 + $0x2c] sm:$0xf]  ;;  %v120_v35 = vld [vmem:[#allocation8 + $0x20] sm:$0xf]  ;;  %v121_v36 = vld [vmem:[#allocation8 + $0x24] sm:$0xf] }
  0x3b   :  { %v289_v19 = vcombine.low %v158_v13, %v159_v14  ;;  %v288_v26 = vcombine.low %v156_v20, %v157_v21  ;;  %v154_v31 = vadd.bf16 %v138_v27, %v90_v29  ;;  %v136_v38 = vmul.bf16 %v120_v35, %v104_v33  ;;  %v88_v40 = vld [vmem:[#allocation6 + $0x20] sm:$0xf]  ;;  %v89_v41 = vld [vmem:[#allocation6 + $0x24] sm:$0xf]  ;;  %v102_v44 = vld [vmem:[#allocation9 + $0x18] sm:$0xf] }
  0x3c   :  { %v155_v32 = vadd.bf16 %v139_v28, %v91_v30  ;;  %v137_v39 = vmul.bf16 %v121_v36, %v105_v34  ;;  %v103_v45 = vld [vmem:[#allocation9 + $0x1c] sm:$0xf]  ;;  %v118_v46 = vld [vmem:[#allocation8 + $0x18] sm:$0xf]  ;;  %v100_v55 = vld [vmem:[#allocation9 + $0x10] sm:$0xf] }
  0x3d   :  { %301 = vmatpush3.bf16.xpose.msra.mxu0 %v289_v19  ;;  %v152_v42 = vadd.bf16 %v136_v38, %v88_v40  ;;  %v119_v47 = vld [vmem:[#allocation8 + $0x1c] sm:$0xf]  ;;  %v134_v49 = vmul.bf16 %v118_v46, %v102_v44  ;;  %v86_v51 = vld [vmem:[#allocation6 + $0x18] sm:$0xf]  ;;  %v101_v56 = vld [vmem:[#allocation9 + $0x14] sm:$0xf] }
  0x3e   :  { %302 = vmatprep.subr.bf16.mxu0 %v443_v0  ;;  %v287_v37 = vcombine.low %v154_v31, %v155_v32  ;;  %v153_v43 = vadd.bf16 %v137_v39, %v89_v41  ;;  %v135_v50 = vmul.bf16 %v119_v47, %v103_v45  ;;  %v87_v52 = vld [vmem:[#allocation6 + $0x1c] sm:$0xf]  ;;  %v116_v57 = vld [vmem:[#allocation8 + $0x10] sm:$0xf]  ;;  %v117_v58 = vld [vmem:[#allocation8 + $0x14] sm:$0xf] }
  0x3f   :  { %v150_v53 = vadd.bf16 %v134_v49, %v86_v51  ;;  %v132_v60 = vmul.bf16 %v116_v57, %v100_v55  ;;  %v133_v61 = vmul.bf16 %v117_v58, %v101_v56  ;;  %v84_v62 = vld [vmem:[#allocation6 + $0x10] sm:$0xf]  ;;  %v85_v63 = vld [vmem:[#allocation6 + $0x14] sm:$0xf]  ;;  %v98_v3 = vld [vmem:[#allocation9 + $0x8] sm:$0xf] }
  0x40   :  { %v286_v48 = vcombine.low %v152_v42, %v153_v43  ;;  %v151_v54 = vadd.bf16 %v135_v50, %v87_v52  ;;  %v99_v4 = vld [vmem:[#allocation9 + $0xc] sm:$0xf]  ;;  %v114_v5 = vld [vmem:[#allocation8 + $0x8] sm:$0xf]  ;;  %v96_v14 = vld [vmem:[#allocation9] sm:$0xf] }
  0x41   :  { %v148_v1 = vadd.bf16 %v132_v60, %v84_v62  ;;  %v149_v2 = vadd.bf16 %v133_v61, %v85_v63  ;;  %v115_v6 = vld [vmem:[#allocation8 + $0xc] sm:$0xf]  ;;  %v130_v8 = vmul.bf16 %v114_v5, %v98_v3  ;;  %v82_v10 = vld [vmem:[#allocation6 + $0x8] sm:$0xf]  ;;  %v97_v15 = vld [vmem:[#allocation9 + $0x4] sm:$0xf] }
  0x42   :  { %v285_v59 = vcombine.low %v150_v53, %v151_v54  ;;  %v131_v9 = vmul.bf16 %v115_v6, %v99_v4  ;;  %v83_v11 = vld [vmem:[#allocation6 + $0xc] sm:$0xf]  ;;  %v112_v16 = vld [vmem:[#allocation8] sm:$0xf]  ;;  %v113_v17 = vld [vmem:[#allocation8 + $0x4] sm:$0xf] }
  0x43   :  { %v284_v7 = vcombine.low %v148_v1, %v149_v2  ;;  %v146_v12 = vadd.bf16 %v130_v8, %v82_v10  ;;  %v128_v19 = vmul.bf16 %v112_v16, %v96_v14  ;;  %v129_v20 = vmul.bf16 %v113_v17, %v97_v15  ;;  %v80_v21 = vld [vmem:[#allocation6] sm:$0xf]  ;;  %v81_v22 = vld [vmem:[#allocation6 + $0x4] sm:$0xf]  ;;  %v290_v27 = vld [vmem:[%s516_s4] ss:$0 sm:$0xff] }
  0x44   :  { %v147_v13 = vadd.bf16 %v131_v9, %v83_v11  ;;  %s445_s13 = smov [#allocation11]  }
  0x45   :  { %303 = vmatpush3.bf16.xpose.msra.mxu0 %v288_v26  ;;  %v144_v23 = vadd.bf16 %v128_v19, %v80_v21  ;;  %v145_v24 = vadd.bf16 %v129_v20, %v81_v22  ;;  %v161_v26 = vld [vmem:[#allocation3] sm:$0xf]  ;;  %s271_s14 = sshll.u32 %s445_s13, 4  ;;  %s272_s14 = int_to_ptr.vmem [resolvable:$true] %s271_s14 }
  0x46   :  { %304 = vmatprep.subr.bf16.mxu0 %v443_v0  ;;  %v283_v18 = vcombine.low %v146_v12, %v147_v13  ;;  %s409_s15 = scalar_lea.vmem %s272_s14, 128  ;;  %p414_p7 = scmp.lt.s32.totalorder %s272_s14, %s272_s14 }
  0x47   :  { %v282_v25 = vcombine.low %v144_v23, %v145_v24  ;;  %p410_p6 = scmp.ne.s32.totalorder %s272_s14, %s409_s15  ;;  %p415_p8 = scmp.lt.s32.totalorder %s409_s15, %s409_s15 }
  0x49   :  { %p416_p9 = por %p415_p8, %p414_p7 }
  0x4b   :  { %p417_p10 = pnand %p416_p9, %p410_p6 }
  0x4d   :  { %305 = vmatpush3.bf16.xpose.msra.mxu0 %v287_v37 }
  0x4e   :  { %306 = vmatprep.subr.bf16.mxu0 %v443_v0 }
  0x55   :  { %307 = vmatpush3.bf16.xpose.msra.mxu0 %v286_v48 }
  0x56   :  { %308 = vmatprep.subr.bf16.mxu0 %v443_v0 }
  0x5d   :  { %309 = vmatpush3.bf16.xpose.msra.mxu0 %v285_v59 }
  0x5e   :  { %310 = vmatprep.subr.bf16.mxu0 %v443_v0 }
  0x65   :  { %311 = vmatpush3.bf16.xpose.msra.mxu0 %v284_v7 }
  0x66   :  { %312 = vmatprep.subr.bf16.mxu0 %v443_v0 }
  0x6d   :  { %313 = vmatpush3.bf16.xpose.msra.mxu0 %v283_v18 }
  0x6e   :  { %314 = vmatprep.subr.bf16.mxu0 %v443_v0 }
  0x75   :  { %315 = vmatpush3.bf16.xpose.msra.mxu0 %v282_v25 }
  0x7c   :  { %317 = vmatmul.mubr.bf16.vlgmr.msra.gmra.mxu0 %v161_v26 }
 0x13c   :  { %v244_v28 = vpop.f32.mrf.mxu0 }
 0x13d   :  { %v263_v29 = vadd.f32 %v290_v27, %v244_v28 }
 0x13e   :  { %v318_v30 = vpop.f32.mrf.mxu0 }
 0x13f   :  { %264 = vst [vmem:[#allocation11] sm:$0xff] %v263_v29 }
 0x140   :  { %v247_v31 = vpop.f32.mrf.mxu0 }
 0x141   :  { %420 = shalt.err (!%p417_p10)
}
 0x142   :  { %274 = dma.vmem_to_hbm [thread:$0]  %s272_s14, 128, %s517_s5, [#allocation5]   ;;  %v319_v0 = vpop.f32.mrf.mxu0 }
 0x143   :  { %435 = dma.done.wait [#allocation5], 128  }
 0x144   :  { %436 = vsyncadd [#allocation5], 4294967168 }
 0x145   :  { %278 = vsyncpa [#allocation4], 1 }
 0x146   :  { %279 = vsyncpa [#allocation7], 1 }
 0x147   :  { %280 = vsyncpa [#allocation10], 1 }
 0x148   :  { %281 = vsyncpa [#allocation5], 1 }

</bundles_post_ra>
